<compile_context>
chip_gen: v5e
topology: v5e:2x2
jax: 0.10.0
libtpu: 0.0.40
codegen_flags: <defaults>
</compile_context>

<pallas_src>
import jax
import jax.numpy as jnp
from jax import lax
from jax.experimental import pallas as pl
from jax.experimental.pallas import tpu as pltpu

LANE = 128


def outconv_kernel(w_ref, b_ref, x_ref, o_ref):
    # w_ref: SMEM (Cout*Cin,) f32 scalars (flattened -> no 2D SMEM padding)
    # b_ref: SMEM (Cout,)     f32 scalars
    # x_ref: VMEM (1, Cin,  rt, 128)
    # o_ref: VMEM (1, Cout, rt, 128)
    cin = x_ref.shape[1]
    cout = o_ref.shape[1]
    rt = x_ref.shape[2]

    # Channel mix on one (rows, 128) slab of pixels: unrolled VPU FMAs with
    # scalar weights read from SMEM.  (Deliberately NOT the MXU — the 3x4
    # weight would waste the systolic array and force channel-on-lane
    # transposes through the XLU.)
    def mix(rows):
        for co in range(cout):
            acc = (x_ref[0, 0, rows, :].astype(jnp.float32) * w_ref[co * cin]
                   + b_ref[co])
            for ci in range(1, cin):
                acc = acc + (x_ref[0, ci, rows, :].astype(jnp.float32)
                             * w_ref[co * cin + ci])
            o_ref[0, co, rows, :] = acc.astype(o_ref.dtype)

    # Stream the row axis in sublane-aligned chunks so only ~(Cin+1) slabs are
    # live at a time (avoids spilling the 64-entry vreg file at MiB blocks).
    cs = rt
    for cand in (64, 56, 48, 40, 32, 24, 16, 8):
        if rt % cand == 0:
            cs = cand
            break
    n_chunks = rt // cs

    if n_chunks == 1:
        mix(slice(None))
    else:
        def body(c, carry):
            r0 = pl.multiple_of(c * cs, cs)
            mix(pl.ds(r0, cs))
            return carry

        lax.fori_loop(0, n_chunks, body, 0, unroll=False)


def out_conv(x_nchw, weight, bias, *, max_rows=2048, vmem_budget_bytes=24 << 20):
    """1x1 Conv2d forward.

    x_nchw: (N, Cin, H, W)
    weight: (Cout, Cin) or (Cout, Cin, 1, 1)
    bias:   (Cout,)
    returns (N, Cout, H, W), same dtype as x.
    """
    N, Cin, H, W = x_nchw.shape
    Cout = weight.shape[0]
    S = H * W

    # Tiny parameters: flatten weight to 1D (avoids 2D SMEM padding), f32.
    w = weight.reshape(Cout, Cin).astype(jnp.float32).reshape(Cout * Cin)
    b = bias.reshape(Cout).astype(jnp.float32)

    # Spatial axis -> (R rows, 128 lanes).  Free reshape when S % 128 == 0;
    # otherwise pad the flat spatial axis once and slice the result back.
    R = pl.cdiv(S, LANE)
    S_pad = R * LANE
    x3 = x_nchw.reshape(N, Cin, S)
    if S_pad != S:
        x3 = jnp.pad(x3, ((0, 0), (0, 0), (0, S_pad - S)))
    x4 = x3.reshape(N, Cin, R, LANE)

    # Row tile: as large as possible under the double-buffered VMEM budget;
    # a multiple of 8 unless it covers the whole row axis.
    bytes_per_row = 2 * (Cin + Cout) * LANE * 4        # dbl-buffered in+out, f32
    rt_budget = max(8, (vmem_budget_bytes // bytes_per_row) // 8 * 8)
    rt_cap = min(max_rows, rt_budget)
    rt = R if R <= rt_cap else rt_cap
    # Guarantee >= 2 grid steps so both v7x TensorCores get work.
    if N * pl.cdiv(R, rt) < 2 and R >= 9:
        rt = ((R // 2 + 7) // 8) * 8

    grid = (N, pl.cdiv(R, rt))

    y4 = pl.pallas_call(
        outconv_kernel,
        out_shape=jax.ShapeDtypeStruct((N, Cout, R, LANE), x_nchw.dtype),
        grid_spec=pltpu.PrefetchScalarGridSpec(
            num_scalar_prefetch=0,
            grid=grid,
            in_specs=[
                # Tiny parameter tensors live in SMEM for cheap scalar reads.
                pl.BlockSpec(memory_space=pltpu.MemorySpace.SMEM),  # weight
                pl.BlockSpec(memory_space=pltpu.MemorySpace.SMEM),  # bias
                # Activations: pixels packed onto (sublanes, lanes).
                pl.BlockSpec((1, Cin, rt, LANE), lambda n, r: (n, 0, r, 0)),
            ],
            out_specs=pl.BlockSpec((1, Cout, rt, LANE), lambda n, r: (n, 0, r, 0)),
        ),
        compiler_params=pltpu.CompilerParams(
            dimension_semantics=("parallel", "parallel"),
            vmem_limit_bytes=32 * 1024 * 1024,
        ),
    )(w, b, x4)

    y3 = y4.reshape(N, Cout, S_pad)
    if S_pad != S:
        y3 = y3[:, :, :S]
    return y3.reshape(N, Cout, H, W)


if __name__ == "__main__":
    # Small shapes consistent with OutConv(in_channels=4, out_channels=3).
    N, Cin, H, W = 2, 4, 16, 16
    Cout = 3

    key = jax.random.PRNGKey(0)
    kx, kw, kb, kx2 = jax.random.split(key, 4)

    x = jax.random.normal(kx, (N, Cin, H, W), dtype=jnp.float32)

    # Deterministic PyTorch-style init (uniform bound 1/sqrt(fan_in)).
    bound = 1.0 / jnp.sqrt(jnp.float32(Cin * 1 * 1))
    weight = jax.random.uniform(kw, (Cout, Cin, 1, 1), minval=-bound,
                                maxval=bound, dtype=jnp.float32)
    bias = jax.random.uniform(kb, (Cout,), minval=-bound, maxval=bound,
                              dtype=jnp.float32)

    y = jax.block_until_ready(out_conv(x, weight, bias))
    y_ref = (jnp.einsum("nchw,oc->nohw", x, weight.reshape(Cout, Cin))
             + bias[None, :, None, None])
    assert y.shape == (N, Cout, H, W)
    assert jnp.allclose(y, y_ref, atol=1e-5, rtol=1e-5)

    # Also exercise the padded path (H*W not a multiple of 128).
    x2 = jax.random.normal(kx2, (1, Cin, 10, 10), dtype=jnp.float32)
    y2 = jax.block_until_ready(out_conv(x2, weight, bias))
    y2_ref = (jnp.einsum("nchw,oc->nohw", x2, weight.reshape(Cout, Cin))
              + bias[None, :, None, None])
    assert jnp.allclose(y2, y2_ref, atol=1e-5, rtol=1e-5)

    print("KERNEL_OK")
</pallas_src>

<mosaic_0001>
module attributes {stable_mosaic.version = 11 : i64} {
  func.func @outconv_kernel(%arg0: i32, %arg1: i32, %arg2: memref<12xf32, #tpu.memory_space<smem>>, %arg3: memref<3xf32, #tpu.memory_space<smem>>, %arg4: memref<1x4x2x128xf32, #tpu.memory_space<vmem>>, %arg5: memref<1x3x2x128xf32, #tpu.memory_space<vmem>>) attributes {dimension_semantics = [#tpu.dimension_semantics<parallel>, #tpu.dimension_semantics<parallel>], iteration_bounds = array<i64: 2, 1>, scalar_prefetch = 0 : i64, scratch_operands = 0 : i64, tpu.core_type = #tpu.core_type<tc>, window_params = [{transform_indices = @transform_0, window_bounds = array<i64: 12>}, {transform_indices = @transform_1, window_bounds = array<i64: 3>}, {transform_indices = @transform_2, window_bounds = array<i64: 1, 4, 2, 128>}, {transform_indices = @transform_3, window_bounds = array<i64: 1, 3, 2, 128>}]} {
    %c0 = arith.constant 0 : index
    %c0_0 = arith.constant 0 : index
    %c0_1 = arith.constant 0 : index
    %c0_2 = arith.constant 0 : index
    %0 = vector.load %arg4[%c0, %c0_0, %c0_1, %c0_2] : memref<1x4x2x128xf32, #tpu.memory_space<vmem>>, vector<1x1x2x128xf32>
    %1 = vector.shape_cast %0 : vector<1x1x2x128xf32> to vector<2x128xf32>
    %c0_3 = arith.constant 0 : index
    %2 = memref.load %arg2[%c0_3] : memref<12xf32, #tpu.memory_space<smem>>
    %3 = vector.broadcast %2 : f32 to vector<2x128xf32>
    %4 = arith.mulf %1, %3 : vector<2x128xf32>
    %c0_4 = arith.constant 0 : index
    %5 = memref.load %arg3[%c0_4] : memref<3xf32, #tpu.memory_space<smem>>
    %6 = vector.broadcast %5 : f32 to vector<2x128xf32>
    %7 = arith.addf %4, %6 : vector<2x128xf32>
    %c0_5 = arith.constant 0 : index
    %c1 = arith.constant 1 : index
    %c0_6 = arith.constant 0 : index
    %c0_7 = arith.constant 0 : index
    %8 = vector.load %arg4[%c0_5, %c1, %c0_6, %c0_7] : memref<1x4x2x128xf32, #tpu.memory_space<vmem>>, vector<1x1x2x128xf32>
    %9 = vector.shape_cast %8 : vector<1x1x2x128xf32> to vector<2x128xf32>
    %c1_8 = arith.constant 1 : index
    %10 = memref.load %arg2[%c1_8] : memref<12xf32, #tpu.memory_space<smem>>
    %11 = vector.broadcast %10 : f32 to vector<2x128xf32>
    %12 = arith.mulf %9, %11 : vector<2x128xf32>
    %13 = arith.addf %7, %12 : vector<2x128xf32>
    %c0_9 = arith.constant 0 : index
    %c2 = arith.constant 2 : index
    %c0_10 = arith.constant 0 : index
    %c0_11 = arith.constant 0 : index
    %14 = vector.load %arg4[%c0_9, %c2, %c0_10, %c0_11] : memref<1x4x2x128xf32, #tpu.memory_space<vmem>>, vector<1x1x2x128xf32>
    %15 = vector.shape_cast %14 : vector<1x1x2x128xf32> to vector<2x128xf32>
    %c2_12 = arith.constant 2 : index
    %16 = memref.load %arg2[%c2_12] : memref<12xf32, #tpu.memory_space<smem>>
    %17 = vector.broadcast %16 : f32 to vector<2x128xf32>
    %18 = arith.mulf %15, %17 : vector<2x128xf32>
    %19 = arith.addf %13, %18 : vector<2x128xf32>
    %c0_13 = arith.constant 0 : index
    %c3 = arith.constant 3 : index
    %c0_14 = arith.constant 0 : index
    %c0_15 = arith.constant 0 : index
    %20 = vector.load %arg4[%c0_13, %c3, %c0_14, %c0_15] : memref<1x4x2x128xf32, #tpu.memory_space<vmem>>, vector<1x1x2x128xf32>
    %21 = vector.shape_cast %20 : vector<1x1x2x128xf32> to vector<2x128xf32>
    %c3_16 = arith.constant 3 : index
    %22 = memref.load %arg2[%c3_16] : memref<12xf32, #tpu.memory_space<smem>>
    %23 = vector.broadcast %22 : f32 to vector<2x128xf32>
    %24 = arith.mulf %21, %23 : vector<2x128xf32>
    %25 = arith.addf %19, %24 : vector<2x128xf32>
    %c0_17 = arith.constant 0 : index
    %c0_18 = arith.constant 0 : index
    %c0_19 = arith.constant 0 : index
    %c0_20 = arith.constant 0 : index
    %26 = vector.load %arg5[%c0_17, %c0_18, %c0_19, %c0_20] : memref<1x3x2x128xf32, #tpu.memory_space<vmem>>, vector<1x1x2x128xf32>
    %27 = vector.shape_cast %26 : vector<1x1x2x128xf32> to vector<2x128xf32>
    %28 = vector.shape_cast %25 : vector<2x128xf32> to vector<1x1x2x128xf32>
    tpu.vector_store %arg5[%c0_17, %c0_18, %c0_19, %c0_20], %28 {strides = array<i32>} : memref<1x3x2x128xf32, #tpu.memory_space<vmem>>, vector<1x1x2x128xf32>,
    %c0_21 = arith.constant 0 : index
    %c0_22 = arith.constant 0 : index
    %c0_23 = arith.constant 0 : index
    %c0_24 = arith.constant 0 : index
    %29 = vector.load %arg4[%c0_21, %c0_22, %c0_23, %c0_24] : memref<1x4x2x128xf32, #tpu.memory_space<vmem>>, vector<1x1x2x128xf32>
    %30 = vector.shape_cast %29 : vector<1x1x2x128xf32> to vector<2x128xf32>
    %c4 = arith.constant 4 : index
    %31 = memref.load %arg2[%c4] : memref<12xf32, #tpu.memory_space<smem>>
    %32 = vector.broadcast %31 : f32 to vector<2x128xf32>
    %33 = arith.mulf %30, %32 : vector<2x128xf32>
    %c1_25 = arith.constant 1 : index
    %34 = memref.load %arg3[%c1_25] : memref<3xf32, #tpu.memory_space<smem>>
    %35 = vector.broadcast %34 : f32 to vector<2x128xf32>
    %36 = arith.addf %33, %35 : vector<2x128xf32>
    %c0_26 = arith.constant 0 : index
    %c1_27 = arith.constant 1 : index
    %c0_28 = arith.constant 0 : index
    %c0_29 = arith.constant 0 : index
    %37 = vector.load %arg4[%c0_26, %c1_27, %c0_28, %c0_29] : memref<1x4x2x128xf32, #tpu.memory_space<vmem>>, vector<1x1x2x128xf32>
    %38 = vector.shape_cast %37 : vector<1x1x2x128xf32> to vector<2x128xf32>
    %c5 = arith.constant 5 : index
    %39 = memref.load %arg2[%c5] : memref<12xf32, #tpu.memory_space<smem>>
    %40 = vector.broadcast %39 : f32 to vector<2x128xf32>
    %41 = arith.mulf %38, %40 : vector<2x128xf32>
    %42 = arith.addf %36, %41 : vector<2x128xf32>
    %c0_30 = arith.constant 0 : index
    %c2_31 = arith.constant 2 : index
    %c0_32 = arith.constant 0 : index
    %c0_33 = arith.constant 0 : index
    %43 = vector.load %arg4[%c0_30, %c2_31, %c0_32, %c0_33] : memref<1x4x2x128xf32, #tpu.memory_space<vmem>>, vector<1x1x2x128xf32>
    %44 = vector.shape_cast %43 : vector<1x1x2x128xf32> to vector<2x128xf32>
    %c6 = arith.constant 6 : index
    %45 = memref.load %arg2[%c6] : memref<12xf32, #tpu.memory_space<smem>>
    %46 = vector.broadcast %45 : f32 to vector<2x128xf32>
    %47 = arith.mulf %44, %46 : vector<2x128xf32>
    %48 = arith.addf %42, %47 : vector<2x128xf32>
    %c0_34 = arith.constant 0 : index
    %c3_35 = arith.constant 3 : index
    %c0_36 = arith.constant 0 : index
    %c0_37 = arith.constant 0 : index
    %49 = vector.load %arg4[%c0_34, %c3_35, %c0_36, %c0_37] : memref<1x4x2x128xf32, #tpu.memory_space<vmem>>, vector<1x1x2x128xf32>
    %50 = vector.shape_cast %49 : vector<1x1x2x128xf32> to vector<2x128xf32>
    %c7 = arith.constant 7 : index
    %51 = memref.load %arg2[%c7] : memref<12xf32, #tpu.memory_space<smem>>
    %52 = vector.broadcast %51 : f32 to vector<2x128xf32>
    %53 = arith.mulf %50, %52 : vector<2x128xf32>
    %54 = arith.addf %48, %53 : vector<2x128xf32>
    %c0_38 = arith.constant 0 : index
    %c1_39 = arith.constant 1 : index
    %c0_40 = arith.constant 0 : index
    %c0_41 = arith.constant 0 : index
    %55 = vector.load %arg5[%c0_38, %c1_39, %c0_40, %c0_41] : memref<1x3x2x128xf32, #tpu.memory_space<vmem>>, vector<1x1x2x128xf32>
    %56 = vector.shape_cast %55 : vector<1x1x2x128xf32> to vector<2x128xf32>
    %57 = vector.shape_cast %54 : vector<2x128xf32> to vector<1x1x2x128xf32>
    tpu.vector_store %arg5[%c0_38, %c1_39, %c0_40, %c0_41], %57 {strides = array<i32>} : memref<1x3x2x128xf32, #tpu.memory_space<vmem>>, vector<1x1x2x128xf32>,
    %c0_42 = arith.constant 0 : index
    %c0_43 = arith.constant 0 : index
    %c0_44 = arith.constant 0 : index
    %c0_45 = arith.constant 0 : index
    %58 = vector.load %arg4[%c0_42, %c0_43, %c0_44, %c0_45] : memref<1x4x2x128xf32, #tpu.memory_space<vmem>>, vector<1x1x2x128xf32>
    %59 = vector.shape_cast %58 : vector<1x1x2x128xf32> to vector<2x128xf32>
    %c8 = arith.constant 8 : index
    %60 = memref.load %arg2[%c8] : memref<12xf32, #tpu.memory_space<smem>>
    %61 = vector.broadcast %60 : f32 to vector<2x128xf32>
    %62 = arith.mulf %59, %61 : vector<2x128xf32>
    %c2_46 = arith.constant 2 : index
    %63 = memref.load %arg3[%c2_46] : memref<3xf32, #tpu.memory_space<smem>>
    %64 = vector.broadcast %63 : f32 to vector<2x128xf32>
    %65 = arith.addf %62, %64 : vector<2x128xf32>
    %c0_47 = arith.constant 0 : index
    %c1_48 = arith.constant 1 : index
    %c0_49 = arith.constant 0 : index
    %c0_50 = arith.constant 0 : index
    %66 = vector.load %arg4[%c0_47, %c1_48, %c0_49, %c0_50] : memref<1x4x2x128xf32, #tpu.memory_space<vmem>>, vector<1x1x2x128xf32>
    %67 = vector.shape_cast %66 : vector<1x1x2x128xf32> to vector<2x128xf32>
    %c9 = arith.constant 9 : index
    %68 = memref.load %arg2[%c9] : memref<12xf32, #tpu.memory_space<smem>>
    %69 = vector.broadcast %68 : f32 to vector<2x128xf32>
    %70 = arith.mulf %67, %69 : vector<2x128xf32>
    %71 = arith.addf %65, %70 : vector<2x128xf32>
    %c0_51 = arith.constant 0 : index
    %c2_52 = arith.constant 2 : index
    %c0_53 = arith.constant 0 : index
    %c0_54 = arith.constant 0 : index
    %72 = vector.load %arg4[%c0_51, %c2_52, %c0_53, %c0_54] : memref<1x4x2x128xf32, #tpu.memory_space<vmem>>, vector<1x1x2x128xf32>
    %73 = vector.shape_cast %72 : vector<1x1x2x128xf32> to vector<2x128xf32>
    %c10 = arith.constant 10 : index
    %74 = memref.load %arg2[%c10] : memref<12xf32, #tpu.memory_space<smem>>
    %75 = vector.broadcast %74 : f32 to vector<2x128xf32>
    %76 = arith.mulf %73, %75 : vector<2x128xf32>
    %77 = arith.addf %71, %76 : vector<2x128xf32>
    %c0_55 = arith.constant 0 : index
    %c3_56 = arith.constant 3 : index
    %c0_57 = arith.constant 0 : index
    %c0_58 = arith.constant 0 : index
    %78 = vector.load %arg4[%c0_55, %c3_56, %c0_57, %c0_58] : memref<1x4x2x128xf32, #tpu.memory_space<vmem>>, vector<1x1x2x128xf32>
    %79 = vector.shape_cast %78 : vector<1x1x2x128xf32> to vector<2x128xf32>
    %c11 = arith.constant 11 : index
    %80 = memref.load %arg2[%c11] : memref<12xf32, #tpu.memory_space<smem>>
    %81 = vector.broadcast %80 : f32 to vector<2x128xf32>
    %82 = arith.mulf %79, %81 : vector<2x128xf32>
    %83 = arith.addf %77, %82 : vector<2x128xf32>
    %c0_59 = arith.constant 0 : index
    %c2_60 = arith.constant 2 : index
    %c0_61 = arith.constant 0 : index
    %c0_62 = arith.constant 0 : index
    %84 = vector.load %arg5[%c0_59, %c2_60, %c0_61, %c0_62] : memref<1x3x2x128xf32, #tpu.memory_space<vmem>>, vector<1x1x2x128xf32>
    %85 = vector.shape_cast %84 : vector<1x1x2x128xf32> to vector<2x128xf32>
    %86 = vector.shape_cast %83 : vector<2x128xf32> to vector<1x1x2x128xf32>
    tpu.vector_store %arg5[%c0_59, %c2_60, %c0_61, %c0_62], %86 {strides = array<i32>} : memref<1x3x2x128xf32, #tpu.memory_space<vmem>>, vector<1x1x2x128xf32>,
    return
  }
  func.func @transform_0(%arg0: i32, %arg1: i32) -> i32 {
    %c0_i32 = arith.constant 0 : i32
    %c0_i32_0 = arith.constant 0 : i32
    return %c0_i32 : i32
  }
  func.func @transform_1(%arg0: i32, %arg1: i32) -> i32 {
    %c0_i32 = arith.constant 0 : i32
    %c0_i32_0 = arith.constant 0 : i32
    return %c0_i32 : i32
  }
  func.func @transform_2(%arg0: i32, %arg1: i32) -> (i32, i32, i32, i32) {
    %c0_i32 = arith.constant 0 : i32
    %c0_i32_0 = arith.constant 0 : i32
    %c0_i32_1 = arith.constant 0 : i32
    return %arg0, %c0_i32, %arg1, %c0_i32_0 : i32, i32, i32, i32
  }
  func.func @transform_3(%arg0: i32, %arg1: i32) -> (i32, i32, i32, i32) {
    %c0_i32 = arith.constant 0 : i32
    %c0_i32_0 = arith.constant 0 : i32
    %c0_i32_1 = arith.constant 0 : i32
    return %arg0, %c0_i32, %arg1, %c0_i32_0 : i32, i32, i32, i32
  }
}

</mosaic_0001>

<bundles_post_ra>
// kernel: tpu_custom_call.1
= control target key start
LH: loop header
LB: loop body
LE: loop exit
PB: predicated region body
PF: predicated region fallthrough
CT: control target
= control target key end

     0   :  { %s919_s0 = inlined_call_operand.hbm [shape: f32[12], index: 0, kind: input, shape index: {}]   ;;  %s920_s1 = inlined_call_operand.hbm [shape: f32[3], index: 1, kind: input, shape index: {}]   ;;  %s921_s2 = inlined_call_operand.hbm [shape: f32[2,4,2,128], index: 2, kind: input, shape index: {}]   ;;  %s922_s3 = inlined_call_operand.hbm [shape: f32[2,3,2,128], index: 3, kind: output, shape index: {}]  }
   0x1   :  { %923 = sst [smem:[#allocation14_spill]] %s919_s0 }
   0x2   :  { %8 = vsyncpa [#allocation5], 0 }
   0x3   :  { %9 = vsyncpa [#allocation7], 0 }
   0x4   :  { %10 = vsyncpa [#allocation3], 0 }
   0x5   :  { %12 = vsyncpa [#allocation3 + $0x1], 0 }
   0x6   :  { %13 = vsyncpa [#allocation4], 0 }
   0x7   :  { %15 = vsyncpa [#allocation4 + $0x1], 0  ;;  %s741_s12 = smov 0   ;;  %s743_s13 = smov 0  }
   0x8   :  { %s745_s14 = smov 0   ;;  %s747_s15 = smov 0  }
   0x9   :  { %s749_s16 = smov 0   ;;  %s751_s17 = smov 0  }
   0xa LB: > { %s433_s18 = sadd.s32 4294967295, %s713_s17   ;;  %s434_s19 = sadd.s32 4294967294, %s713_s17   ;;  %s713_s17 = sphi %s751_s17, %s21_s17   ;;  %s709_s16 = sphi %s749_s16, %s936_s16   ;;  %s705_s15 = sphi %s747_s15, %s935_s15   ;;  %s701_s14 = sphi %s745_s14, %s934_s14   ;;  %s697_s13 = sphi %s743_s13, %s933_s13   ;;  %s693_s12 = sphi %s741_s12, %s932_s12  }
   0xb   : > { %s84_s20 = sadd.s32 1, %s701_s14  ;;  %p91_p0 = scmp.ne.s32.totalorder %s701_s14, %s697_s13 }
   0xc   : > { %p92_p1 = scmp.eq.s32.totalorder %s713_s17, 0  ;;  %p97_p2 = scmp.ne.s32.totalorder %s697_s13, %s693_s12 }
   0xd   : > { %p779_p3 = scmp.eq.s32.totalorder %s433_s18, 0  ;;  %p123_p4 = scmp.eq.s32.totalorder %s433_s18, 1 }
   0xe   : > { %p783_p5 = por %p92_p1, %p91_p0  ;;  %p129_p6 = scmp.eq.s32.totalorder %s434_s19, 1 }
   0xf   : > { %p789_p7 = por %p779_p3, %p97_p2  ;;  %p793_p8 = por %p123_p4, %p91_p0 }
  0x10   : > { %p797_p9 = por %p129_p6, %p97_p2  ;;  %p435_p10 = scmp.ge.s32.totalorder %s713_s17, 1 }
  0x11   : > { %p136_p11 = scmp.lt.s32.totalorder %s713_s17, 3  ;;  %s929_s0 = sld [smem:[#allocation14_spill]] }
  0x12   : > { %p438_p13 = scmp.ge.s32.totalorder %s713_s17, 2  ;;  %p505_p0 = scmp.lt.s32.totalorder %s713_s17, 2 }
  0x13   : > { %p806_p12 = pnand %p435_p10, %p136_p11  ;;  %s158_s5 = sshll.u32 %s920_s1, 4  ;;  %s159_s5 = int_to_ptr.hbm [resolvable:$true] %s158_s5 }
  0x14   : > { %p819_p2 = pnand %p505_p0, %p783_p5  ;;  %s715_s7 = smov [#allocation2]  }
  0x15   : > { %p488_p1 = pneg %p806_p12  ;;  %s716_s8 = smov [#allocation6]  }
  0x16   : > { %s33_s9 = sadd.s32 1, %s709_s16  ;;  %s169_s10 = sand.u32 1, %s701_s14  }
  0x17   : > { %s148_s28 = sshll.u32 %s929_s0, 4  ;;  %p489_p4 = pnand %p488_p1, %p779_p3  ;;  %s149_s28 = int_to_ptr.hbm [resolvable:$true] %s148_s28 }
  0x18   : > { %p35_p6 = scmp.ge.s32.totalorder %s33_s9, 2  ;;  %s439_s11 = sshll.u32 %s169_s10, 3 }
  0x19   : > { %491 = dma.hbm_to_smem (!%p489_p4), %s149_s28, 16, %s715_s7, [#allocation5]  }
  0x1a   : > { %494 = dma.hbm_to_smem (!%p489_p4), %s159_s5, 16, %s716_s8, [#allocation7]  }
  0x1b   : > { %s473_s18 = sshll.u32 %s709_s16, 3  ;;  %s938_s9 = smov (%p35_p6, %s33_s9), 0 }
  0x1c   : > { %s179_s26 = scalar_lea.hbm %s921_s2, %s473_s18  ;;  %s79_s27 = ssub.s32 %s709_s16, %s938_s9 }
  0x1d   : > { %s180_s30 = sshll.u32 %s179_s26, 4  ;;  %p82_p5 = scmp.eq.s32.totalorder %s79_s27, 0  ;;  %s181_s30 = int_to_ptr.hbm [resolvable:$true] %s180_s30 }
  0x1e   : > { %s173_s28 = scalar_lea.vmem [#allocation8], %s439_s11  ;;  %s170_s7 = scalar_lea.sflag [#allocation3], %s169_s10 }
  0x1f   : > { %s182_s4 = sshll.u32 %s173_s28, 4  ;;  %s717_s8 = smov 32   ;;  %s183_s4 = int_to_ptr.vmem [resolvable:$true] %s182_s4 }
  0x20   : > { %s838_s5 = scalar_select %p82_p5, %s701_s14, %s84_s20  }
  0x21   : > { %s718_s0 = smov 2   ;;  %194 = sbr.rel (%p806_p12) target bundleno = 78 (0x4e), region = 32 }
  0x22   : > { %498 = dma.hbm_to_vmem [thread:$0]  (!%p819_p2), %s181_s30, 128, %s183_s4, %s170_s7, %s717_s8, %s717_s8, %s718_s0  }
  0x26   : > { %676 = dma.done.wait (%p779_p3), [#allocation5], 16  }
  0x27   : > { %678 = vsyncadd (%p779_p3), [#allocation5], 4294967280 }
  0x28   : > { %680 = dma.done.wait (%p779_p3), [#allocation7], 16  }
  0x29   : > { %682 = vsyncadd (%p779_p3), [#allocation7], 4294967280  ;;  %s853_s20 = sand.u32 1, %s697_s13  }
  0x2a   : > { %s445_s0 = sshll.u32 %s853_s20, 3  ;;  %s207_s29 = scalar_lea.sflag [#allocation3], %s853_s20 }
  0x2b   : > { %s857_s6 = scalar_lea.vmem [#allocation8], %s445_s0 }
  0x2c   : > { %684 = dma.done.wait (%p789_p7), %s207_s29, 128  }
  0x2d   : > { %686 = vsyncadd (%p789_p7), %s207_s29, 4294967168 }
  0x2e   : > { %216 = sfence }
  0x2f   : > { %s236_s10 = sld [smem:[#allocation2]]  ;;  %v235_v0 = vld [vmem:[%s857_s6] sm:$0x3]  ;;  %v446_v2 = vld [vmem:[%s857_s6 + $0x2] sm:$0x3]  ;;  %s474_s28 = smul.u32 6, %s853_s20 }
  0x30   : > { %s239_s21 = sld [smem:[#allocation6]]  ;;  %v448_v5 = vld [vmem:[%s857_s6 + $0x4] sm:$0x3]  ;;  %v450_v7 = vld [vmem:[%s857_s6 + $0x6] sm:$0x3] }
  0x31   : > { %s447_s11 = sld [smem:[#allocation2 + $0x1]]  ;;  %v261_v11 = vld [vmem:[%s857_s6] sm:$0x3]  ;;  %v454_v17 = vld [vmem:[%s857_s6 + $0x2] sm:$0x3] }
  0x32   : > { %s449_s18 = sld [smem:[#allocation2 + $0x2]]  ;;  %v456_v20 = vld [vmem:[%s857_s6 + $0x4] sm:$0x3]  ;;  %v458_v23 = vld [vmem:[%s857_s6 + $0x6] sm:$0x3] }
  0x33   : > { %s451_s19 = sld [smem:[#allocation2 + $0x3]]  ;;  %v285_v27 = vld [vmem:[%s857_s6] sm:$0x3]  ;;  %v463_v34 = vld [vmem:[%s857_s6 + $0x2] sm:$0x3] }
  0x34   : > { %s452_s22 = sld [smem:[#allocation2 + $0x4]]  ;;  %v465_v37 = vld [vmem:[%s857_s6 + $0x4] sm:$0x3]  ;;  %v467_v40 = vld [vmem:[%s857_s6 + $0x6] sm:$0x3]  ;;  %s310_s6 = scalar_lea.sflag [#allocation4], %s853_s20 }
  0x35   : > { %v237_v1 = vstv %s236_s10  ;;  %s453_s26 = sld [smem:[#allocation6 + $0x1]]  ;;  %s475_s10 = smul.u32 6, %s705_s15 }
  0x36   : > { %v238_v3 = vmul.f32 %v237_v1, %v235_v0  ;;  %v240_v4 = vstv %s239_s21  ;;  %s455_s23 = sld [smem:[#allocation2 + $0x5]]  ;;  %s234_s21 = scalar_lea.vmem [#allocation9], %s474_s28 }
  0x37   : > { %v245_v6 = vstv %s447_s11  ;;  %s457_s27 = sld [smem:[#allocation2 + $0x6]]  ;;  %s322_s15 = scalar_lea.hbm %s922_s3, %s475_s10 }
  0x38   : > { %v241_v8 = vadd.f32 %v240_v4, %v238_v3  ;;  %v246_v9 = vmul.f32 %v446_v2, %v245_v6  ;;  %v251_v10 = vstv %s449_s18  ;;  %s459_s30 = sld [smem:[#allocation2 + $0x7]]  ;;  %s643_s28 = scalar_lea.hbm %s922_s3, 12 }
  0x39   : > { %v252_v12 = vmul.f32 %v448_v5, %v251_v10  ;;  %v257_v13 = vstv %s451_s19  ;;  %s461_s4 = sld [smem:[#allocation2 + $0x8]]  ;;  %s323_s19 = sshll.u32 %s234_s21, 4  ;;  %s324_s19 = int_to_ptr.vmem [resolvable:$true] %s323_s19 }
  0x3a   : > { %v247_v14 = vadd.f32 %v246_v9, %v241_v8  ;;  %v258_v15 = vmul.f32 %v450_v7, %v257_v13  ;;  %v263_v16 = vstv %s452_s22  ;;  %s870_s7 = sld [smem:[#allocation6 + $0x2]]  ;;  %s325_s22 = sshll.u32 %s322_s15, 4  ;;  %s326_s22 = int_to_ptr.hbm [resolvable:$true] %s325_s22 }
  0x3b   : > { %v264_v18 = vmul.f32 %v263_v16, %v261_v11  ;;  %v266_v19 = vstv %s453_s26  ;;  %s464_s8 = sld [smem:[#allocation2 + $0x9]]  ;;  %s637_s26 = sshra.s32 %s326_s22, 4  ;;  %s638_s26 = int_to_ptr.hbm [resolvable:$true] %s637_s26 }
  0x3c   : > { %v253_v21 = vadd.f32 %v252_v12, %v247_v14  ;;  %v270_v22 = vstv %s455_s23  ;;  %s466_s0 = sld [smem:[#allocation2 + $0xa]]  ;;  %s639_s23 = scalar_lea.hbm %s638_s26, 6 }
  0x3d   : > { %v267_v24 = vadd.f32 %v266_v19, %v264_v18  ;;  %v271_v25 = vmul.f32 %v454_v17, %v270_v22  ;;  %v275_v26 = vstv %s457_s27  ;;  %s468_s29 = sld [smem:[#allocation2 + $0xb]]  ;;  %p640_p3 = scmp.ne.s32.totalorder %s638_s26, %s639_s23 }
  0x3e   : > { %v259_v28 = vadd.f32 %v258_v15, %v253_v21  ;;  %v276_v29 = vmul.f32 %v456_v20, %v275_v26  ;;  %v280_v30 = vstv %s459_s30  ;;  %p644_p11 = scmp.lt.s32.totalorder %s638_s26, %s922_s3  ;;  %p645_p12 = scmp.lt.s32.totalorder %s643_s28, %s639_s23 }
  0x3f   : > { %v272_v31 = vadd.f32 %v271_v25, %v267_v24  ;;  %v281_v32 = vmul.f32 %v458_v23, %v280_v30  ;;  %v287_v33 = vstv %s461_s4  ;;  %p641_p7 = pnand %p640_p3, %p793_p8 }
  0x40   : > { %260 = vst [vmem:[%s234_s21] sm:$0x3] %v259_v28  ;;  %v288_v35 = vmul.f32 %v287_v33, %v285_v27  ;;  %v290_v36 = vstv %s870_s7  ;;  %p646_p0 = por %p645_p12, %p644_p11 }
  0x41   : > { %v277_v38 = vadd.f32 %v276_v29, %v272_v31  ;;  %v294_v39 = vstv %s464_s8  ;;  %p642_p10 = pneg %p641_p7 }
  0x42   : > { %v291_v41 = vadd.f32 %v290_v36, %v288_v35  ;;  %v295_v42 = vmul.f32 %v463_v34, %v294_v39  ;;  %v299_v43 = vstv %s466_s0 }
  0x43   : > { %v282_v44 = vadd.f32 %v281_v32, %v277_v38  ;;  %v300_v45 = vmul.f32 %v465_v37, %v299_v43  ;;  %v304_v46 = vstv %s468_s29  ;;  %p647_p1 = pnand %p646_p0, %p642_p10 }
  0x44   : > { %v296_v47 = vadd.f32 %v295_v42, %v291_v41  ;;  %v305_v48 = vmul.f32 %v467_v40, %v304_v46 }
  0x45   : > { %460 = vst [vmem:[%s234_s21 + $0x2] sm:$0x3] %v282_v44 }
  0x46   : > { %v301_v49 = vadd.f32 %v300_v45, %v296_v47 }
  0x48   : > { %v306_v50 = vadd.f32 %v305_v48, %v301_v49 }
  0x4a   : > { %469 = vst [vmem:[%s234_s21 + $0x4] sm:$0x3] %v306_v50 }
  0x4b   : > { %650 = shalt.err (!%p647_p1)
}
  0x4c   : > { %s719_s20 = smov 32   ;;  %s720_s8 = smov 2  }
  0x4d   : > { %486 = dma.vmem_to_hbm [thread:$0]  (%p793_p8), %s324_s19, 96, %s326_s22, %s310_s6, %s719_s20, %s719_s20, %s720_s8  }
  0x4e PF: > { %s340_s0 = sand.u32 1, %s693_s12   ;;  %p500_p2 = pnand %p438_p13, %p797_p9 }
  0x4f   : > { %s341_s29 = scalar_lea.sflag [#allocation4], %s340_s0 }
  0x50   : > { %p501_p4 = pneg %p500_p2 }
  0x52   : > { %688 = dma.done.wait (%p501_p4), %s341_s29, 96  }
  0x53   : > { %690 = vsyncadd (%p501_p4), %s341_s29, 4294967200  ;;  %s21_s17 = sadd.s32 1, %s713_s17   ;;  %s932_s12 = smov %s697_s13 }
  0x54   : > { %p18_p6 = scmp.ge.s32.totalorder %s21_s17, 4   ;;  %s933_s13 = smov %s701_s14 }
  0x55   : > { %s934_s14 = smov %s838_s5  ;;  %s935_s15 = smov %s709_s16 }
  0x56   : > { %s936_s16 = smov %s938_s9  ;;  %20 = sbr.rel (!%p18_p6) target bundleno = 10 (0xa), region = 91 }
  0x5b   :  { %347 = vsyncpa [#allocation3], 1 }
  0x5c   :  { %349 = vsyncpa [#allocation3 + $0x1], 1 }
  0x5d   :  { %350 = vsyncpa [#allocation4], 1 }
  0x5e   :  { %352 = vsyncpa [#allocation4 + $0x1], 1 }
  0x5f   :  { %353 = vsyncpa [#allocation5], 1 }
  0x60   :  { %355 = vsyncpa [#allocation5 + $0x1], 1 }
  0x61   :  { %356 = vsyncpa [#allocation7], 1 }

</bundles_post_ra>
